<compile_context>
chip_gen: v6e
topology: v6e:2x2x1
jax: 0.10.0
libtpu: 0.0.40
codegen_flags: <defaults>
</compile_context>

<pallas_src>
import functools
import math

import jax
import jax.numpy as jnp
from jax.experimental import pallas as pl
from jax.experimental.pallas import tpu as pltpu


def _lstm_act(gates, hp):
    """Single LSTM step with zero initial state: h = sigmoid(o)*tanh(sigmoid(i)*tanh(g))."""
    gi = gates[..., 0:hp]
    gg = gates[..., hp:2 * hp]
    go = gates[..., 2 * hp:3 * hp]
    c = jax.nn.sigmoid(gi) * jnp.tanh(gg)
    return jax.nn.sigmoid(go) * jnp.tanh(c)


def _fused_kernel(num_layers, hp, act_dtype, x3_ref, xT_ref, w0_ref, b0_ref, *refs):
    """Fused single-step multi-layer LSTM + fc head + attention over V = G+1 views.

    x3_ref : (G, T, 1) f32   input with trailing size-1 dim so the rank-1 masked
                             view gates are a pure lane-broadcast multiply.
    xT_ref : (T, G) f32      input transposed; all-genes view gates via the MXU.
    w0_ref : (G, 3*Hp) f32   layer-0 [i|g|o] gate weights (transposed, zero-padded).
    b0_ref : (1, 3*Hp) f32   layer-0 fused bias (b_ih + b_hh), zero-padded.
    if num_layers > 1:
      wstack_ref : (L-1, Hp, 3*Hp) bf16  hidden-layer fused gate weights.
      bstack_ref : (L-1, 1, 3*Hp) f32    hidden-layer fused biases.
    wfc_ref : (1, Hp) f32,  bfc_ref : (1, 1) f32 (SMEM)
    outputs: y_pred (1, T), yi_pred (G, T), attention (G, 1)  — all f32.
    """
    if num_layers > 1:
        (wstack_ref, bstack_ref, wfc_ref, bfc_ref,
         y_ref, yi_ref, att_ref) = refs
    else:
        wfc_ref, bfc_ref, y_ref, yi_ref, att_ref = refs
        wstack_ref = bstack_ref = None

    G, T, _ = x3_ref.shape
    V = G + 1

    w0 = w0_ref[...]                                                    # (G, 3Hp) f32
    b0 = b0_ref[...]                                                    # (1, 3Hp) f32

    # ---- layer 0 -----------------------------------------------------------
    # all-genes view: one MXU matmul, replaces a G-deep VALU reduction.
    gates_all = jnp.dot(xT_ref[...], w0,
                        preferred_element_type=jnp.float32) + b0        # (T, 3Hp)
    # single-gene masked views are rank-1: gates[i, t, :] = x[i, t] * w0[i, :] + b0
    gates_masked = x3_ref[...] * w0[:, None, :] + b0                    # (G, T, 3Hp)

    h_all = _lstm_act(gates_all, hp)                                    # (T, Hp) f32
    h_masked = _lstm_act(gates_masked, hp).reshape(G * T, hp)           # (G*T, Hp) f32

    # Build the (V*T, Hp) activation slab ONCE (no per-gate concats).  Stored in
    # act_dtype (bf16) when it feeds another MXU matmul; nonlinearities stay f32.
    dt0 = act_dtype if num_layers > 1 else jnp.float32
    h = jnp.concatenate([h_all.astype(dt0), h_masked.astype(dt0)], axis=0)

    # ---- hidden layers: ONE fused (Hp, 3Hp) matmul per layer ---------------
    for l in range(num_layers - 1):
        w = wstack_ref[l]                                               # (Hp, 3Hp) bf16
        b = bstack_ref[l]                                               # (1, 3Hp) f32
        gates = jnp.dot(h, w, preferred_element_type=jnp.float32) + b   # (V*T, 3Hp) f32
        hf = _lstm_act(gates, hp)                                       # f32
        # keep the last layer's h in f32 for the fc head; bf16 otherwise.
        h = hf if l == num_layers - 2 else hf.astype(act_dtype)

    # ---- fc head: lane reduce over Hp (keeps the (V, T) layout, no relayout) ---
    y = jnp.sum(h.reshape(V, T, hp) * wfc_ref[...], axis=-1) + bfc_ref[0, 0]   # (V, T)

    y_all = y[0:1, :]                                                   # (1, T)
    yi = y[1:, :]                                                       # (G, T)
    yi_ref[...] = yi                                                    # whole-tile store

    # ---- attention over genes (exact softmax: weights sum to 1) ------------
    logits = jnp.sum(yi * y_all, axis=1, keepdims=True)                 # (G, 1)
    m = jnp.max(logits, axis=0, keepdims=True)
    e = jnp.exp(logits - m)
    att = e / jnp.sum(e, axis=0, keepdims=True)
    att_ref[...] = att
    y_ref[...] = jnp.sum(att * yi, axis=0, keepdims=True)               # (1, T)


def init_params(key, input_size, hidden_size, num_layers):
    """Deterministic synthetic parameters (PyTorch-style U(-1/sqrt(H), 1/sqrt(H)))."""
    params = {"hidden_size": hidden_size, "num_layers": num_layers}
    k = 1.0 / math.sqrt(hidden_size)
    keys = jax.random.split(key, 3 * num_layers + 2)
    ki = 0
    for l in range(num_layers):
        in_l = input_size if l == 0 else hidden_size
        params[f"w_ih_{l}"] = jax.random.uniform(
            keys[ki], (4 * hidden_size, in_l), jnp.float32, -k, k); ki += 1
        # weight_hh_l{l} exists in torch but multiplies h0 == 0 (seq_len==1) -> no effect.
        params[f"b_ih_{l}"] = jax.random.uniform(
            keys[ki], (4 * hidden_size,), jnp.float32, -k, k); ki += 1
        params[f"b_hh_{l}"] = jax.random.uniform(
            keys[ki], (4 * hidden_size,), jnp.float32, -k, k); ki += 1
    params["w_fc"] = jax.random.uniform(keys[ki], (1, hidden_size), jnp.float32, -k, k); ki += 1
    params["b_fc"] = jax.random.uniform(keys[ki], (1,), jnp.float32, -k, k)
    return params


def single_view_attention_lstm_regressor(x, params, *, matmul_dtype=jnp.bfloat16):
    """Mirrors SingleViewAttentionLSTMBasedRegressor.forward (seq_len == 1 path).

    x: (n_gene, n_timepoint) float32
    returns (y_pred (T,), yi_pred (G, T), attention_weight (G,))
    Note: hidden-layer weights/activations use `matmul_dtype` (bf16 by default)
    for the MXU; pass jnp.float32 if bit-tighter precision is required.
    """
    assert x.ndim == 2, "expects (n_gene, n_timepoint); kernel assumes seq_len == 1"
    n_gene, n_timepoint = x.shape
    num_layers = params["num_layers"]
    H = params["hidden_size"]
    Hp = max(128, ((H + 127) // 128) * 128)          # lane-dense hidden dim
    f32 = jnp.float32
    x = x.astype(f32)

    def pad_h(a):                                     # zero-pad last dim H -> Hp
        pad = [(0, 0)] * (a.ndim - 1) + [(0, Hp - H)]
        return jnp.pad(a, pad)

    def pack_gates_w(w_ih, in_pad):
        # w_ih: (4H, in_dim), torch gate order i, f, g, o (forget gate unused: c0 == 0).
        def one(gate):
            wt = pad_h(w_ih[gate * H:(gate + 1) * H].T)        # (in_dim, Hp)
            if in_pad > wt.shape[0]:
                wt = jnp.pad(wt, ((0, in_pad - wt.shape[0]), (0, 0)))
            return wt
        return jnp.concatenate([one(0), one(2), one(3)], axis=1)   # (in_pad, 3Hp)

    def pack_gates_b(b):
        return jnp.concatenate([pad_h(b[0:H]), pad_h(b[2 * H:3 * H]),
                                pad_h(b[3 * H:4 * H])]).reshape(1, 3 * Hp)

    # Layer 0 (f32: feeds a tiny MXU matmul + the rank-1 VPU broadcast).
    w0 = pack_gates_w(params["w_ih_0"], in_pad=n_gene).astype(f32)       # (G, 3Hp)
    b0 = pack_gates_b(params["b_ih_0"] + params["b_hh_0"]).astype(f32)   # (1, 3Hp)
    kernel_inputs = [x[:, :, None], x.T, w0, b0]

    # Hidden layers: stacked fused gate weights (one bf16 slab, one f32 bias slab).
    if num_layers > 1:
        ws, bs = [], []
        for l in range(1, num_layers):
            ws.append(pack_gates_w(params[f"w_ih_{l}"], in_pad=Hp).astype(matmul_dtype))
            bs.append(pack_gates_b(params[f"b_ih_{l}"] + params[f"b_hh_{l}"]).astype(f32))
        kernel_inputs += [jnp.stack(ws), jnp.stack(bs)]   # (L-1,Hp,3Hp), (L-1,1,3Hp)

    kernel_inputs += [pad_h(params["w_fc"]).astype(f32),                 # (1, Hp)
                      params["b_fc"].reshape(1, 1).astype(f32)]          # (1, 1) SMEM

    # Advisory cost + VMEM budget (working set + headroom, capped for v7x's 64 MiB).
    V = n_gene + 1
    in_bytes = sum(int(a.size) * a.dtype.itemsize for a in kernel_inputs)
    out_bytes = 4 * (n_timepoint + n_gene * n_timepoint + n_gene)
    gate_slab = 4 * V * n_timepoint * 3 * Hp
    vmem_limit = int(min(max(in_bytes + out_bytes + 8 * gate_slab, 16 * 2**20), 48 * 2**20))
    flops = (2 * n_timepoint * n_gene * 3 * Hp                 # all-genes layer-0 matmul
             + 2 * n_gene * n_timepoint * 3 * Hp               # rank-1 masked gates
             + 2 * max(num_layers - 1, 0) * V * n_timepoint * Hp * 3 * Hp
             + 2 * V * n_timepoint * Hp                        # fc head
             + 4 * n_gene * n_timepoint)                       # attention
    transcendentals = 4 * num_layers * V * n_timepoint * Hp

    vmem = pl.BlockSpec(memory_space=pltpu.MemorySpace.VMEM)
    smem = pl.BlockSpec(memory_space=pltpu.MemorySpace.SMEM)

    # TODO(synk): for production-scale n_gene, block the view dimension with a grid
    # (dimension_semantics=("parallel",), view tile sized per chip: ~half on v7x's
    # 64 MiB VMEM / 2 TCs) and finish the attention softmax+weighted-sum in a tiny
    # second pass; the demo sizes are optimal as a single grid-less call.
    y2d, yi_pred, att2d = pl.pallas_call(
        functools.partial(_fused_kernel, num_layers, Hp, matmul_dtype),
        out_shape=(jax.ShapeDtypeStruct((1, n_timepoint), f32),
                   jax.ShapeDtypeStruct((n_gene, n_timepoint), f32),
                   jax.ShapeDtypeStruct((n_gene, 1), f32)),
        in_specs=[vmem] * (len(kernel_inputs) - 1) + [smem],
        out_specs=(vmem, vmem, vmem),
        compiler_params=pltpu.CompilerParams(vmem_limit_bytes=vmem_limit),
        cost_estimate=pl.CostEstimate(flops=int(flops),
                                      transcendentals=int(transcendentals),
                                      bytes_accessed=int(in_bytes + out_bytes)),
    )(*kernel_inputs)

    return y2d[0], yi_pred, att2d[:, 0]


def reference_forward(x, params):
    """Plain-JAX f32 reference mirroring the PyTorch forward (sanity check)."""
    n_gene, _ = x.shape
    H = params["hidden_size"]
    L = params["num_layers"]
    xt = x.T
    eye = jnp.eye(n_gene, dtype=x.dtype)
    views = jnp.concatenate([xt[None], xt[None] * eye[:, None, :]], axis=0)
    ys = []
    for v in range(n_gene + 1):
        h = views[v]
        for l in range(L):
            w = params[f"w_ih_{l}"]
            b = params[f"b_ih_{l}"] + params[f"b_hh_{l}"]
            gates = h @ w.T + b
            i_g = jax.nn.sigmoid(gates[:, 0:H])
            g_g = jnp.tanh(gates[:, 2 * H:3 * H])
            o_g = jax.nn.sigmoid(gates[:, 3 * H:4 * H])
            h = o_g * jnp.tanh(i_g * g_g)
        ys.append(h @ params["w_fc"][0] + params["b_fc"][0])
    y = jnp.stack(ys)
    y_all, yi = y[0:1], y[1:]
    att = jax.nn.softmax(y_all @ yi.T, axis=1)
    return (att @ yi)[0], yi, att[0]


if __name__ == "__main__":
    n_gene, n_timepoint = 4, 16          # x: (n_gene, n_timepoint); input_size == n_gene
    hidden_size, num_layers = 32, 2

    key = jax.random.PRNGKey(0)
    kx, kp = jax.random.split(key)
    x = jax.random.normal(kx, (n_gene, n_timepoint), dtype=jnp.float32)
    params = init_params(kp, input_size=n_gene, hidden_size=hidden_size,
                         num_layers=num_layers)

    y_pred, yi_pred, att = single_view_attention_lstm_regressor(x, params)
    jax.block_until_ready((y_pred, yi_pred, att))

    ry, ryi, ratt = reference_forward(x, params)
    assert y_pred.shape == (n_timepoint,)
    assert yi_pred.shape == (n_gene, n_timepoint)
    assert att.shape == (n_gene,)
    assert jnp.allclose(y_pred, ry, atol=5e-2, rtol=5e-2)
    assert jnp.allclose(yi_pred, ryi, atol=5e-2, rtol=5e-2)
    assert jnp.allclose(att, ratt, atol=5e-2, rtol=5e-2)
    assert jnp.allclose(jnp.sum(att), 1.0, atol=1e-5)   # exact softmax

    print("KERNEL_OK")
</pallas_src>

<mosaic_0001>
module attributes {stable_mosaic.version = 11 : i64} {
  func.func @_fused_kernel(%arg0: memref<4x16x1xf32, #tpu.memory_space<vmem>>, %arg1: memref<16x4xf32, #tpu.memory_space<vmem>>, %arg2: memref<4x384xf32, #tpu.memory_space<vmem>>, %arg3: memref<1x384xf32, #tpu.memory_space<vmem>>, %arg4: memref<1x128x384xbf16, #tpu.memory_space<vmem>>, %arg5: memref<1x1x384xf32, #tpu.memory_space<vmem>>, %arg6: memref<1x128xf32, #tpu.memory_space<vmem>>, %arg7: memref<1x1xf32, #tpu.memory_space<smem>>, %arg8: memref<1x16xf32, #tpu.memory_space<vmem>>, %arg9: memref<4x16xf32, #tpu.memory_space<vmem>>, %arg10: memref<4x1xf32, #tpu.memory_space<vmem>>) attributes {dimension_semantics = [], scalar_prefetch = 0 : i64, scratch_operands = 0 : i64, tpu.core_type = #tpu.core_type<tc>} {
    %c0 = arith.constant 0 : index
    %c0_0 = arith.constant 0 : index
    %0 = vector.load %arg2[%c0, %c0_0] : memref<4x384xf32, #tpu.memory_space<vmem>>, vector<4x384xf32>
    %c0_1 = arith.constant 0 : index
    %c0_2 = arith.constant 0 : index
    %1 = vector.load %arg3[%c0_1, %c0_2] : memref<1x384xf32, #tpu.memory_space<vmem>>, vector<1x384xf32>
    %c0_3 = arith.constant 0 : index
    %c0_4 = arith.constant 0 : index
    %2 = vector.load %arg1[%c0_3, %c0_4] : memref<16x4xf32, #tpu.memory_space<vmem>>, vector<16x4xf32>
    %cst = arith.constant dense<0.000000e+00> : vector<16x384xf32>
    %3 = tpu.matmul %2, %0, %cst {dimension_numbers = #tpu.dot_dimension_numbers<[1], [0], [0], [1], [0, 0, 1, 1], [], []>} : vector<16x4xf32>, vector<4x384xf32>, vector<16x384xf32> -> vector<16x384xf32>
    %4 = vector.broadcast %1 : vector<1x384xf32> to vector<16x384xf32>
    %5 = arith.addf %3, %4 : vector<16x384xf32>
    %c0_5 = arith.constant 0 : index
    %c0_6 = arith.constant 0 : index
    %c0_7 = arith.constant 0 : index
    %6 = vector.load %arg0[%c0_5, %c0_6, %c0_7] : memref<4x16x1xf32, #tpu.memory_space<vmem>>, vector<4x16x1xf32>
    %7 = vector.shape_cast %0 : vector<4x384xf32> to vector<4x1x384xf32>
    %8 = vector.broadcast %6 : vector<4x16x1xf32> to vector<4x16x384xf32>
    %9 = vector.broadcast %7 : vector<4x1x384xf32> to vector<4x16x384xf32>
    %10 = arith.mulf %8, %9 : vector<4x16x384xf32>
    %11 = vector.shape_cast %1 : vector<1x384xf32> to vector<1x1x384xf32>
    %12 = vector.broadcast %11 : vector<1x1x384xf32> to vector<4x16x384xf32>
    %13 = arith.addf %10, %12 : vector<4x16x384xf32>
    %14 = vector.extract_strided_slice %5 {offsets = [0, 0], sizes = [16, 128], strides = [1, 1]} : vector<16x384xf32> to vector<16x128xf32>
    %15 = vector.extract_strided_slice %5 {offsets = [0, 128], sizes = [16, 128], strides = [1, 1]} : vector<16x384xf32> to vector<16x128xf32>
    %16 = vector.extract_strided_slice %5 {offsets = [0, 256], sizes = [16, 128], strides = [1, 1]} : vector<16x384xf32> to vector<16x128xf32>
    %17 = arith.negf %14 : vector<16x128xf32>
    %18 = math.exp %17 : vector<16x128xf32>
    %cst_8 = arith.constant 1.000000e+00 : f32
    %19 = vector.broadcast %cst_8 : f32 to vector<16x128xf32>
    %20 = arith.addf %19, %18 : vector<16x128xf32>
    %21 = arith.divf %19, %20 : vector<16x128xf32>
    %22 = math.tanh %15 : vector<16x128xf32>
    %23 = arith.mulf %21, %22 : vector<16x128xf32>
    %24 = arith.negf %16 : vector<16x128xf32>
    %25 = math.exp %24 : vector<16x128xf32>
    %cst_9 = arith.constant 1.000000e+00 : f32
    %26 = vector.broadcast %cst_9 : f32 to vector<16x128xf32>
    %27 = arith.addf %26, %25 : vector<16x128xf32>
    %28 = arith.divf %26, %27 : vector<16x128xf32>
    %29 = math.tanh %23 : vector<16x128xf32>
    %30 = arith.mulf %28, %29 : vector<16x128xf32>
    %31 = vector.extract_strided_slice %13 {offsets = [0, 0, 0], sizes = [4, 16, 128], strides = [1, 1, 1]} : vector<4x16x384xf32> to vector<4x16x128xf32>
    %32 = vector.extract_strided_slice %13 {offsets = [0, 0, 128], sizes = [4, 16, 128], strides = [1, 1, 1]} : vector<4x16x384xf32> to vector<4x16x128xf32>
    %33 = vector.extract_strided_slice %13 {offsets = [0, 0, 256], sizes = [4, 16, 128], strides = [1, 1, 1]} : vector<4x16x384xf32> to vector<4x16x128xf32>
    %34 = arith.negf %31 : vector<4x16x128xf32>
    %35 = math.exp %34 : vector<4x16x128xf32>
    %cst_10 = arith.constant 1.000000e+00 : f32
    %36 = vector.broadcast %cst_10 : f32 to vector<4x16x128xf32>
    %37 = arith.addf %36, %35 : vector<4x16x128xf32>
    %38 = arith.divf %36, %37 : vector<4x16x128xf32>
    %39 = math.tanh %32 : vector<4x16x128xf32>
    %40 = arith.mulf %38, %39 : vector<4x16x128xf32>
    %41 = arith.negf %33 : vector<4x16x128xf32>
    %42 = math.exp %41 : vector<4x16x128xf32>
    %cst_11 = arith.constant 1.000000e+00 : f32
    %43 = vector.broadcast %cst_11 : f32 to vector<4x16x128xf32>
    %44 = arith.addf %43, %42 : vector<4x16x128xf32>
    %45 = arith.divf %43, %44 : vector<4x16x128xf32>
    %46 = math.tanh %40 : vector<4x16x128xf32>
    %47 = arith.mulf %45, %46 : vector<4x16x128xf32>
    %48 = vector.shape_cast %47 : vector<4x16x128xf32> to vector<64x128xf32>
    %49 = arith.truncf %30 : vector<16x128xf32> to vector<16x128xbf16>
    %50 = arith.truncf %48 : vector<64x128xf32> to vector<64x128xbf16>
    %51 = tpu.concatenate %49, %50 in 0 : vector<16x128xbf16>, vector<64x128xbf16> -> vector<80x128xbf16>
    %c0_12 = arith.constant 0 : index
    %c0_13 = arith.constant 0 : index
    %c0_14 = arith.constant 0 : index
    %52 = vector.load %arg4[%c0_12, %c0_13, %c0_14] : memref<1x128x384xbf16, #tpu.memory_space<vmem>>, vector<1x128x384xbf16>
    %53 = vector.shape_cast %52 : vector<1x128x384xbf16> to vector<128x384xbf16>
    %c0_15 = arith.constant 0 : index
    %c0_16 = arith.constant 0 : index
    %c0_17 = arith.constant 0 : index
    %54 = vector.load %arg5[%c0_15, %c0_16, %c0_17] : memref<1x1x384xf32, #tpu.memory_space<vmem>>, vector<1x1x384xf32>
    %55 = vector.shape_cast %54 : vector<1x1x384xf32> to vector<1x384xf32>
    %cst_18 = arith.constant dense<0.000000e+00> : vector<80x384xf32>
    %56 = tpu.matmul %51, %53, %cst_18 {dimension_numbers = #tpu.dot_dimension_numbers<[1], [0], [0], [1], [0, 0, 1, 1], [], []>} : vector<80x128xbf16>, vector<128x384xbf16>, vector<80x384xf32> -> vector<80x384xf32>
    %57 = vector.broadcast %55 : vector<1x384xf32> to vector<80x384xf32>
    %58 = arith.addf %56, %57 : vector<80x384xf32>
    %59 = vector.extract_strided_slice %58 {offsets = [0, 0], sizes = [80, 128], strides = [1, 1]} : vector<80x384xf32> to vector<80x128xf32>
    %60 = vector.extract_strided_slice %58 {offsets = [0, 128], sizes = [80, 128], strides = [1, 1]} : vector<80x384xf32> to vector<80x128xf32>
    %61 = vector.extract_strided_slice %58 {offsets = [0, 256], sizes = [80, 128], strides = [1, 1]} : vector<80x384xf32> to vector<80x128xf32>
    %62 = arith.negf %59 : vector<80x128xf32>
    %63 = math.exp %62 : vector<80x128xf32>
    %cst_19 = arith.constant 1.000000e+00 : f32
    %64 = vector.broadcast %cst_19 : f32 to vector<80x128xf32>
    %65 = arith.addf %64, %63 : vector<80x128xf32>
    %66 = arith.divf %64, %65 : vector<80x128xf32>
    %67 = math.tanh %60 : vector<80x128xf32>
    %68 = arith.mulf %66, %67 : vector<80x128xf32>
    %69 = arith.negf %61 : vector<80x128xf32>
    %70 = math.exp %69 : vector<80x128xf32>
    %cst_20 = arith.constant 1.000000e+00 : f32
    %71 = vector.broadcast %cst_20 : f32 to vector<80x128xf32>
    %72 = arith.addf %71, %70 : vector<80x128xf32>
    %73 = arith.divf %71, %72 : vector<80x128xf32>
    %74 = math.tanh %68 : vector<80x128xf32>
    %75 = arith.mulf %73, %74 : vector<80x128xf32>
    %76 = vector.shape_cast %75 : vector<80x128xf32> to vector<5x16x128xf32>
    %c0_21 = arith.constant 0 : index
    %c0_22 = arith.constant 0 : index
    %77 = vector.load %arg6[%c0_21, %c0_22] : memref<1x128xf32, #tpu.memory_space<vmem>>, vector<1x128xf32>
    %78 = vector.shape_cast %77 : vector<1x128xf32> to vector<1x1x128xf32>
    %79 = vector.broadcast %78 : vector<1x1x128xf32> to vector<5x16x128xf32>
    %80 = arith.mulf %76, %79 : vector<5x16x128xf32>
    %cst_23 = arith.constant dense<0.000000e+00> : vector<5x16xf32>
    %81 = vector.multi_reduction <add>, %80, %cst_23 [2] : vector<5x16x128xf32> to vector<5x16xf32>
    %c0_24 = arith.constant 0 : index
    %c0_25 = arith.constant 0 : index
    %82 = memref.load %arg7[%c0_24, %c0_25] : memref<1x1xf32, #tpu.memory_space<smem>>
    %83 = vector.broadcast %82 : f32 to vector<5x16xf32>
    %84 = arith.addf %81, %83 : vector<5x16xf32>
    %85 = vector.extract_strided_slice %84 {offsets = [0, 0], sizes = [1, 16], strides = [1, 1]} : vector<5x16xf32> to vector<1x16xf32>
    %86 = vector.extract_strided_slice %84 {offsets = [1, 0], sizes = [4, 16], strides = [1, 1]} : vector<5x16xf32> to vector<4x16xf32>
    %c0_26 = arith.constant 0 : index
    %c0_27 = arith.constant 0 : index
    %87 = vector.load %arg9[%c0_26, %c0_27] : memref<4x16xf32, #tpu.memory_space<vmem>>, vector<4x16xf32>
    tpu.vector_store %arg9[%c0_26, %c0_27], %86 {strides = array<i32>} : memref<4x16xf32, #tpu.memory_space<vmem>>, vector<4x16xf32>,
    %88 = vector.broadcast %85 : vector<1x16xf32> to vector<4x16xf32>
    %89 = arith.mulf %86, %88 : vector<4x16xf32>
    %cst_28 = arith.constant dense<0.000000e+00> : vector<4xf32>
    %90 = vector.multi_reduction <add>, %89, %cst_28 [1] : vector<4x16xf32> to vector<4xf32>
    %91 = vector.shape_cast %90 : vector<4xf32> to vector<4x1xf32>
    %cst_29 = arith.constant dense<0xFF800000> : vector<1xf32>
    %92 = vector.multi_reduction <maximumf>, %91, %cst_29 [0] : vector<4x1xf32> to vector<1xf32>
    %93 = vector.shape_cast %92 : vector<1xf32> to vector<1x1xf32>
    %94 = vector.broadcast %93 : vector<1x1xf32> to vector<4x1xf32>
    %95 = arith.subf %91, %94 : vector<4x1xf32>
    %96 = math.exp %95 : vector<4x1xf32>
    %cst_30 = arith.constant dense<0.000000e+00> : vector<1xf32>
    %97 = vector.multi_reduction <add>, %96, %cst_30 [0] : vector<4x1xf32> to vector<1xf32>
    %98 = vector.shape_cast %97 : vector<1xf32> to vector<1x1xf32>
    %99 = vector.broadcast %98 : vector<1x1xf32> to vector<4x1xf32>
    %100 = arith.divf %96, %99 : vector<4x1xf32>
    %c0_31 = arith.constant 0 : index
    %c0_32 = arith.constant 0 : index
    %101 = vector.load %arg10[%c0_31, %c0_32] : memref<4x1xf32, #tpu.memory_space<vmem>>, vector<4x1xf32>
    tpu.vector_store %arg10[%c0_31, %c0_32], %100 {strides = array<i32>} : memref<4x1xf32, #tpu.memory_space<vmem>>, vector<4x1xf32>,
    %102 = vector.broadcast %100 : vector<4x1xf32> to vector<4x16xf32>
    %103 = arith.mulf %102, %86 : vector<4x16xf32>
    %cst_33 = arith.constant dense<0.000000e+00> : vector<16xf32>
    %104 = vector.multi_reduction <add>, %103, %cst_33 [0] : vector<4x16xf32> to vector<16xf32>
    %105 = vector.shape_cast %104 : vector<16xf32> to vector<1x16xf32>
    %c0_34 = arith.constant 0 : index
    %c0_35 = arith.constant 0 : index
    %106 = vector.load %arg8[%c0_34, %c0_35] : memref<1x16xf32, #tpu.memory_space<vmem>>, vector<1x16xf32>
    tpu.vector_store %arg8[%c0_34, %c0_35], %105 {strides = array<i32>} : memref<1x16xf32, #tpu.memory_space<vmem>>, vector<1x16xf32>,
    return
  }
}

</mosaic_0001>

<bundles_post_ra>
// kernel: tpu_custom_call.1
= control target key start
LH: loop header
LB: loop body
LE: loop exit
PB: predicated region body
PF: predicated region fallthrough
CT: control target
= control target key end

     0   :  { %17 = vsyncpa [#allocation4], 0  ;;  %s2179_s0 = inlined_call_operand.vmem [shape: f32[4,16,1], index: 0, kind: input, shape index: {}]   ;;  %s2180_s1 = inlined_call_operand.vmem [shape: f32[16,4], index: 1, kind: input, shape index: {}]   ;;  %s2181_s2 = inlined_call_operand.vmem [shape: f32[4,384], index: 2, kind: input, shape index: {}]   ;;  %s2182_s3 = inlined_call_operand.vmem [shape: f32[1,384], index: 3, kind: input, shape index: {}]   ;;  %s2183_s4 = inlined_call_operand.hbm [shape: bf16[1,128,384], index: 4, kind: input, shape index: {}]   ;;  %s2184_s5 = inlined_call_operand.vmem [shape: f32[1,1,384], index: 5, kind: input, shape index: {}]   ;;  %s2185_s6 = inlined_call_operand.vmem [shape: f32[1,128], index: 6, kind: input, shape index: {}]   ;;  %s2186_s7 = inlined_call_operand.<no memory space> [shape: f32[1,1], index: 7, kind: input, shape index: {}]   ;;  %s2187_s8 = inlined_call_operand.hbm [shape: f32[1,16], index: 8, kind: output, shape index: {0}]   ;;  %s2188_s9 = inlined_call_operand.hbm [shape: f32[4,16], index: 9, kind: output, shape index: {1}]   ;;  %s2189_s10 = inlined_call_operand.vmem [shape: f32[4,1], index: 10, kind: output, shape index: {2}]  }
   0x1   :  { %18 = vsyncpa [#allocation5], 0 }
   0x2   :  { %19 = vsyncpa [#allocation8], 0  ;;  %s1798_s13 = smov [#allocation3]  }
   0x3   :  { %s33_s14 = sshll.u32 %s1798_s13, 4  ;;  %s34_s14 = int_to_ptr.vmem [resolvable:$true] %s33_s14 }
   0x4   :  { %s1740_s15 = scalar_lea.vmem %s34_s14, 3072  ;;  %p1745_p1 = scmp.lt.s32.totalorder %s34_s14, %s34_s14 }
   0x5   :  { %p1741_p0 = scmp.ne.s32.totalorder %s34_s14, %s1740_s15  ;;  %p1746_p2 = scmp.lt.s32.totalorder %s1740_s15, %s1740_s15 }
   0x7   :  { %p1747_p3 = por %p1746_p2, %p1745_p1 }
   0x9   :  { %p1748_p4 = pnand %p1747_p3, %p1741_p0 }
   0xb   :  { %1751 = shalt.err (!%p1748_p4)
}
   0xc   :  { %s1799_s16 = smov 192   ;;  %s1800_s17 = smov 12  }
   0xd   :  { %39 = dma.hbm_to_vmem [thread:$0]  %s2183_s4, 3072, %s34_s14, [#allocation4], %s1799_s16, %s1799_s16, %s1800_s17  }
   0xe   :  { %1792 = dma.done.wait [#allocation4], 3072  }
   0xf   :  { %1793 = vsyncadd [#allocation4], 4294964224  ;;  %v56_v0 = vlaneseq  ;;  %v1801_v1 = vmov 1966171168   ;;  %v1802_v3 = vmov 0.0   ;;  %v1803_v5 = vmov 0  }
  0x10   :  { %v249_v2 = vunpack.c.l.s4 %v1801_v1  ;;  %152 = vmatprep.mubr.f32.mxu0 %v1802_v3  ;;  %1454 = vset.pattern.permute.xlu1 %v1803_v5  ;;  %v50_v8 = vld [vmem:[%s2181_s2] sm:$0xff]  ;;  %vm81_vm0 = vcmask 1043456   ;;  %vm74_vm1 = vcmask 31744   ;;  %v51_v12 = vld [vmem:[%s2181_s2 + $0x8] sm:$0xf]  ;;  %v242_v13 = vld [vmem:[%s2179_s0 + $0x10] sm:$0xff] }
  0x11   :  { %v1867_v4 = vshrl.u32 %v56_v0, 7  ;;  %1453 = vset.pattern.permute.xlu0 %v1803_v5  ;;  %v53_v9 = vld [vmem:[%s2180_s1] sm:$0xff]  ;;  %v73_v10 = vcombine.high %v50_v8, %v50_v8  ;;  %1403 = vmatprep.subr.msk.mxu1 %vm81_vm0, %v51_v12  ;;  %v54_v16 = vld [vmem:[%s2180_s1 + $0x8] sm:$0xff]  ;;  %v243_v17 = vld [vmem:[%s2179_s0 + $0x18] sm:$0xff]  ;;  %vm1804_vm2 = vmmov 0   ;;  %vm1154_vm3 = vcmask 130112  }
  0x12   :  { %v250_v6 = vunpack.c.0.s8 %v249_v2  ;;  %1405 = vmatprep.mubr.msk.f32.mxu1 %vm74_vm1, %v53_v9  ;;  %292 = vperm.xlu1 %1454, %v242_v13   ;;  %v240_v15 = vld [vmem:[%s2179_s0] sm:$0xff]  ;;  %v241_v20 = vld [vmem:[%s2179_s0 + $0x8] sm:$0xff]  ;;  %v247_v23 = vld [vmem:[%s2179_s0 + $0x38] sm:$0xff]  ;;  %vm1183_vm4 = vcmask 1041409   ;;  %vm1185_vm5 = vcmask 1042434   ;;  %vm1187_vm6 = vcmask 1043459  }
  0x13   :  { %1315 = vmatprep.subr.msk.mxu0 %vm81_vm0, %v73_v10  ;;  %1404 = vmatpush3.msk.msra.mxu1 %vm81_vm0, %v51_v12  ;;  %v245_v21 = vld [vmem:[%s2179_s0 + $0x28] sm:$0xff]  ;;  %v244_v22 = vld [vmem:[%s2179_s0 + $0x20] sm:$0xff]  ;;  %v246_v24 = vld [vmem:[%s2179_s0 + $0x30] sm:$0xff]  ;;  %v1941_v49 = vsub.s32 0, %v1867_v4  ;;  %v1958_v55 = vsub.s32 2, %v1867_v4  ;;  %v1961_v56 = vsub.s32 1, %v1867_v4 }
  0x14   :  { %v1872_v7 = vsub.s32 %v250_v6, %v1867_v4  ;;  %1316 = vmatpush1.msk.msra.mxu0 %vm81_vm0, %v50_v8  ;;  %1406 = vmatmul.mubr.msk.f32.vlgmr.msra.gmra.mxu1 %vm74_vm1, %v54_v16  ;;  %v1458_v25 = vld [vmem:[#allocation3 + $0xac] ss:$12 sps:$4 sm:$0xff]   ;;  %v1456_v26 = vld [vmem:[#allocation3 + $0xa8] ss:$12 sps:$4 sm:$0xff]   ;;  %v1459_v27 = vld [vmem:[#allocation3 + $0xb0] ss:$12 sps:$4 sm:$0xff]  }
  0x15   :  { %1317 = vmatmul.mubr.msk.f32.vlgmr.msra.gmra.mxu0 %vm74_vm1, %v53_v9  ;;  %282 = vperm.xlu0 %1453, %v240_v15   ;;  %v1462_v28 = vld [vmem:[#allocation3 + $0x94] ss:$12 sps:$4 sm:$0xff]   ;;  %v1460_v29 = vld [vmem:[#allocation3 + $0x90] ss:$12 sps:$4 sm:$0xff]   ;;  %v1463_v30 = vld [vmem:[#allocation3 + $0x98] ss:$12 sps:$4 sm:$0xff]  }
  0x16   :  { %v1881_v11 = vrot.slane %v50_v8, %v1872_v7  ;;  %v1892_v14 = vrot.slane %v51_v12, %v1872_v7  ;;  %158 = vmatprep.mubr.f32.mxu0 %v1802_v3  ;;  %297 = vperm.xlu1 %1454, %v243_v17   ;;  %v1466_v31 = vld [vmem:[#allocation3 + $0x7c] ss:$12 sps:$4 sm:$0xff]   ;;  %v1464_v32 = vld [vmem:[#allocation3 + $0x78] ss:$12 sps:$4 sm:$0xff]   ;;  %v1467_v33 = vld [vmem:[#allocation3 + $0x80] ss:$12 sps:$4 sm:$0xff]  }
  0x17   :  { %1408 = vmatprep.subr.bf16.mxu1 %v1802_v3  ;;  %770 = vmatprep.subr.bf16.mxu0 %v1458_v25  ;;  %v1470_v34 = vld [vmem:[#allocation3 + $0x64] ss:$12 sps:$4 sm:$0xff]   ;;  %v1468_v35 = vld [vmem:[#allocation3 + $0x60] ss:$12 sps:$4 sm:$0xff]   ;;  %v1471_v36 = vld [vmem:[#allocation3 + $0x68] ss:$12 sps:$4 sm:$0xff]  }
  0x18   :  { %v262_v18 = vcombine.low %v1881_v11, %v1892_v14  ;;  %v263_v19 = vcombine.high %v1881_v11, %v1892_v14  ;;  %771 = vmatpush1.bf16.msra.mxu0 %v1456_v26  ;;  %1409 = vmatpush3.bf16.msra.mxu1 %v1459_v27  ;;  %v1472_v37 = vld [vmem:[#allocation3 + $0x48] ss:$12 sps:$4 sm:$0xff]   ;;  %v1474_v38 = vld [vmem:[#allocation3 + $0x4c] ss:$12 sps:$4 sm:$0xff]   ;;  %v1475_v39 = vld [vmem:[#allocation3 + $0x50] ss:$12 sps:$4 sm:$0xff]  }
  0x19   :  { %1318 = vmatmul.mubr.msk.f32.gmra.mxu0 %vm74_vm1, %v54_v16  ;;  %287 = vperm.xlu0 %1453, %v241_v20   ;;  %v1478_v40 = vld [vmem:[#allocation3 + $0x34] ss:$12 sps:$4 sm:$0xff]   ;;  %v1476_v41 = vld [vmem:[#allocation3 + $0x30] ss:$12 sps:$4 sm:$0xff]   ;;  %v1479_v42 = vld [vmem:[#allocation3 + $0x38] ss:$12 sps:$4 sm:$0xff]  }
  0x1a   :  { %307 = vperm.xlu1 %1454, %v245_v21   ;;  %802 = vmatprep.mubr.bf16.mxu0 %v1803_v5  ;;  %v1482_v43 = vld [vmem:[#allocation3 + $0x1c] ss:$12 sps:$4 sm:$0xff]   ;;  %v1480_v44 = vld [vmem:[#allocation3 + $0x18] ss:$12 sps:$4 sm:$0xff]   ;;  %v1483_v45 = vld [vmem:[#allocation3 + $0x20] ss:$12 sps:$4 sm:$0xff]   ;;  %v270_v50 = vrot.slane %v262_v18, %v1872_v7  ;;  %v1955_v54 = vrot.slane %v263_v19, %v1872_v7 }
  0x1b   :  { %1410 = vmatprep.subr.bf16.mxu1 %v1802_v3  ;;  %772 = vmatprep.subr.bf16.mxu0 %v1462_v28  ;;  %v1486_v46 = vld [vmem:[#allocation3 + $0x4] ss:$12 sps:$4 sm:$0xff]   ;;  %v1484_v47 = vld [vmem:[#allocation3] ss:$12 sps:$4 sm:$0xff]   ;;  %v1487_v48 = vld [vmem:[#allocation3 + $0x8] ss:$12 sps:$4 sm:$0xff]  }
  0x1c   :  { %773 = vmatpush1.bf16.msra.mxu0 %v1460_v29  ;;  %1411 = vmatpush3.bf16.msra.mxu1 %v1463_v30  ;;  %v323_v52 = vrot.slane %v270_v50, %v1941_v49  ;;  %v52_v53 = vld [vmem:[%s2182_s3] sm:$0x7]  ;;  %v335_v58 = vrot.slane %v1955_v54, %v1941_v49  ;;  %v343_v59 = vrot.slane %v1955_v54, %v1958_v55  ;;  %vm1190_vm7 = vcmask 125952  }
  0x1d   :  { %302 = vperm.xlu0 %1453, %v244_v22   ;;  %1412 = vmatprep.subr.bf16.mxu1 %v1802_v3  ;;  %v1964_v57 = vrot.slane %v52_v53, %v1941_v49  ;;  %v339_v1 = vrot.slane %v1955_v54, %v1961_v56  ;;  %v331_v7 = vrot.slane %v270_v50, %v1958_v55 }
  0x1e   :  { %317 = vperm.xlu1 %1454, %v247_v23   ;;  %774 = vmatprep.subr.bf16.mxu0 %v1466_v31  ;;  %v1976_v10 = vrot.slane %v52_v53, %v1958_v55  ;;  %v327_v12 = vrot.slane %v270_v50, %v1961_v56  ;;  %v1979_v13 = vcombine.high %v270_v50, %v270_v50 }
  0x1f   :  { %1424 = vmatprep.mubr.msk.bf16.mxu1 %vm1804_vm2, %v1802_v3  ;;  %v1982_v14 = vrot.slane %v52_v53, %v1961_v56 }
  0x20   :  { %775 = vmatpush1.bf16.msra.mxu0 %v1464_v32  ;;  %1413 = vmatpush3.bf16.msra.mxu1 %v1467_v33 }
  0x21   :  { %312 = vperm.xlu0 %1453, %v246_v24   ;;  %1414 = vmatprep.subr.bf16.mxu1 %v1802_v3  ;;  %v347_v24 = vrot.slane %v1979_v13, %v1941_v49 }
  0x22   :  { %776 = vmatprep.subr.bf16.mxu0 %v1470_v34 }
  0x24   :  { %777 = vmatpush1.bf16.msra.mxu0 %v1468_v35  ;;  %1415 = vmatpush3.bf16.msra.mxu1 %v1471_v36 }
  0x25   :  { %1416 = vmatprep.subr.bf16.mxu1 %v1802_v3  ;;  %778 = vmatprep.subr.bf16.mxu0 %v1474_v38 }
  0x28   :  { %779 = vmatpush1.bf16.msra.mxu0 %v1472_v37  ;;  %1417 = vmatpush3.bf16.msra.mxu1 %v1475_v39 }
  0x29   :  { %780 = vmatprep.subr.bf16.mxu0 %v1478_v40  ;;  %1418 = vmatprep.subr.bf16.mxu1 %v1802_v3 }
  0x2c   :  { %781 = vmatpush1.bf16.msra.mxu0 %v1476_v41  ;;  %1419 = vmatpush3.bf16.msra.mxu1 %v1479_v42 }
  0x2d   :  { %782 = vmatprep.subr.bf16.mxu0 %v1482_v43  ;;  %1420 = vmatprep.subr.bf16.mxu1 %v1802_v3 }
  0x30   :  { %783 = vmatpush1.bf16.msra.mxu0 %v1480_v44  ;;  %1421 = vmatpush3.bf16.msra.mxu1 %v1483_v45 }
  0x31   :  { %784 = vmatprep.subr.bf16.mxu0 %v1486_v46  ;;  %1422 = vmatprep.subr.bf16.mxu1 %v1802_v3 }
  0x34   :  { %785 = vmatpush1.bf16.msra.mxu0 %v1484_v47  ;;  %1423 = vmatpush3.bf16.msra.mxu1 %v1487_v48 }
  0x8d   :  { %v293_v62 = vpop.permute.xlu1 %292 }
  0x8e   :  { %v386_v2 = vmul.f32 %v335_v58, %v293_v62  ;;  %v388_v6 = vmul.f32 %v343_v59, %v293_v62  ;;  %v387_v11 = vmul.f32 %v339_v1, %v293_v62 }
  0x90   :  { %v283_v51 = vpop.permute.xlu0 %282  ;;  %v410_v16 = vadd.f32 %v386_v2, %v1964_v57  ;;  %v412_v17 = vadd.f32 %v388_v6, %v1976_v10  ;;  %v411_v22 = vadd.f32 %v387_v11, %v1982_v14 }
  0x91   :  { %v380_v60 = vmul.f32 %v323_v52, %v283_v51  ;;  %v298_v15 = vpop.permute.xlu1 %297  ;;  %v382_v18 = vmul.f32 %v331_v7, %v283_v51  ;;  %v381_v23 = vmul.f32 %v327_v12, %v283_v51 }
  0x92   :  { %v389_v20 = vmul.f32 %v335_v58, %v298_v15  ;;  %v391_v26 = vmul.f32 %v343_v59, %v298_v15  ;;  %v1328_v28 = vmul.f32 -1.442695, %v410_v16  ;;  %v1336_v29 = vmul.f32 -1.442695, %v412_v17 }
  0x93   :  { %v404_v8 = vadd.f32 %v380_v60, %v1964_v57  ;;  %v406_v30 = vadd.f32 %v382_v18, %v1976_v10  ;;  %v405_v37 = vadd.f32 %v381_v23, %v1982_v14  ;;  %v390_v38 = vmul.f32 %v339_v1, %v298_v15 }
  0x94   :  { %v288_v61 = vpop.permute.xlu0 %287  ;;  %v413_v32 = vadd.f32 %v389_v20, %v1964_v57  ;;  %v415_v42 = vadd.f32 %v391_v26, %v1976_v10  ;;  %v2003_v58 = vcombine.high %v1955_v54, %v1955_v54  ;;  %v355_v1 = vrot.slane %v1979_v13, %v1958_v55 }
  0x95   :  { %v383_v63 = vmul.f32 %v323_v52, %v288_v61  ;;  %v1326_v19 = vmul.f32 -1.442695, %v404_v8  ;;  %v385_v33 = vmul.f32 %v331_v7, %v288_v61  ;;  %v308_v34 = vpop.permute.xlu1 %307  ;;  %v1334_v45 = vmul.f32 -1.442695, %v406_v30 }
  0x96   :  { %v395_v39 = vmul.f32 %v347_v24, %v308_v34  ;;  %v384_v46 = vmul.f32 %v327_v12, %v288_v61  ;;  %v1329_v47 = vmul.f32 -1.442695, %v413_v32  ;;  %v414_v52 = vadd.f32 %v390_v38, %v1982_v14 }
  0x97   :  { %v407_v9 = vadd.f32 %v383_v63, %v1964_v57  ;;  %1488 = vpow2.f32 %v1326_v19  ;;  %v409_v48 = vadd.f32 %v385_v33, %v1976_v10  ;;  %v1337_v59 = vmul.f32 -1.442695, %v415_v42 }
  0x98   :  { %v1993_v40 = vpop.permute.xlu0 %302  ;;  %v419_v53 = vadd.f32 %v395_v39, %v1964_v57  ;;  %v408_v61 = vadd.f32 %v384_v46, %v1982_v14  ;;  %v359_v54 = vrot.slane %v2003_v58, %v1941_v49  ;;  %v397_v16 = vmul.f32 %v355_v1, %v308_v34 }
  0x99   :  { %v1327_v21 = vmul.f32 -1.442695, %v407_v9  ;;  %v392_v43 = vmul.f32 %v347_v24, %v1993_v40  ;;  %v1335_v63 = vmul.f32 -1.442695, %v409_v48  ;;  %v2013_v8 = vpop.permute.xlu1 %317  ;;  %v351_v9 = vrot.slane %v1979_v13, %v1961_v56 }
  0x9a   :  { %v1331_v6 = vmul.f32 -1.442695, %v419_v53  ;;  %v401_v19 = vmul.f32 %v359_v54, %v2013_v8  ;;  %v363_v42 = vrot.slane %v2003_v58, %v1961_v56 }
  0x9b   :  { %1490 = vpow2.f32 %v1327_v21  ;;  %v416_v60 = vadd.f32 %v392_v43, %v1964_v57  ;;  %v393_v38 = vmul.f32 %v351_v9, %v1993_v40 }
  0x9c   :  { %1492 = vtanh.f32 %v411_v22  ;;  %v2017_v11 = vpop.permute.xlu0 %312  ;;  %v425_v32 = vadd.f32 %v401_v19, %v1964_v57  ;;  %v402_v53 = vmul.f32 %v363_v42, %v2013_v8 }
  0x9d   :  { %v1330_v7 = vmul.f32 -1.442695, %v416_v60  ;;  %v398_v22 = vmul.f32 %v359_v54, %v2017_v11 }
  0x9e   :  { %v1333_v46 = vmul.f32 -1.442695, %v425_v32  ;;  %v426_v54 = vadd.f32 %v402_v53, %v1982_v14 }
  0xa4   :  { %v1489_v15 = vpop.eup %1488 }
  0xa5   :  { %v484_v24 = vadd.f32 1.0, %v1489_v15 }
  0xa8   :  { %v1491_v18 = vpop.eup %1490 }
  0xa9   :  { %v2021_v21 = vpop.eup %1492 }
  0xd4   :  { %v1407_v36 = vpop.f32.mrf.mxu1 }
  0xd5   :  { %v154_v25 = vpop.f32.mrf.mxu0  ;;  %v237_v2 = vadd.f32 %v1407_v36, %v1976_v10 }
  0xd6   :  { %v155_v27 = vadd.f32 %v154_v25, %v1964_v57  ;;  %v231_v51 = vpop.f32.mrf.mxu1  ;;  %v396_v25 = vmul.f32 %v351_v9, %v308_v34  ;;  %v422_v34 = vadd.f32 %v398_v22, %v1964_v57 }
  0xd7   :  { %v156_v31 = vpop.f32.mrf.mxu0  ;;  %v232_v62 = vadd.f32 %v231_v51, %v1976_v10  ;;  %v1325_v17 = vmul.f32 -1.442695, %v237_v2 }
  0xd8   :  { %v1322_v35 = vmul.f32 -1.442695, %v155_v27  ;;  %v157_v20 = vadd.f32 %v156_v31, %v1982_v14  ;;  %v485_v27 = vadd.f32 1.0, %v1491_v18  ;;  %v394_v31 = vmul.f32 %v355_v1, %v1993_v40 }
  0xd9   :  { %v160_v41 = vpop.f32.mrf.mxu0  ;;  %v1324_v12 = vmul.f32 -1.442695, %v232_v62  ;;  %v417_v40 = vadd.f32 %v393_v38, %v1982_v14 }
  0xda   :  { %1494 = vpow2.f32 %v1322_v35  ;;  %v161_v44 = vadd.f32 %v160_v41, %v1964_v57 }
  0xdb   :  { %1496 = vpow2.f32 %v1328_v28  ;;  %v162_v23 = vpop.f32.mrf.mxu0  ;;  %v421_v28 = vadd.f32 %v397_v16, %v1976_v10 }
  0xdc   :  { %1498 = vpow2.f32 %v1336_v29  ;;  %v1323_v50 = vmul.f32 -1.442695, %v161_v44  ;;  %v163_v33 = vadd.f32 %v162_v23, %v1982_v14 }
  0xdd   :  { %1500 = vtanh.f32 %v405_v37  ;;  %v420_v37 = vadd.f32 %v396_v25, %v1982_v14  ;;  %v1339_v41 = vmul.f32 -1.442695, %v421_v28  ;;  %v399_v25 = vmul.f32 %v363_v42, %v2017_v11 }
  0xde   :  { %1502 = vpow2.f32 %v1323_v50 }
  0xdf   :  { %1504 = vpow2.f32 %v1334_v45  ;;  %v418_v45 = vadd.f32 %v394_v31, %v1976_v10 }
  0xe0   :  { %1506 = vpow2.f32 %v1329_v47  ;;  %v1332_v47 = vmul.f32 -1.442695, %v422_v34 }
  0xe1   :  { %1508 = vtanh.f32 %v414_v52  ;;  %v367_v52 = vrot.slane %v2003_v58, %v1958_v55  ;;  %v1338_v60 = vmul.f32 -1.442695, %v418_v45 }
  0xe2   :  { %1510 = vpow2.f32 %v1337_v59 }
  0xe3   :  { %1512 = vtanh.f32 %v408_v61  ;;  %v400_v19 = vmul.f32 %v367_v52, %v2017_v11 }
  0xe4   :  { %1514 = vpow2.f32 %v1335_v63 }
  0xe5   :  { %1516 = vpow2.f32 %v1331_v6  ;;  %v403_v6 = vmul.f32 %v367_v52, %v2013_v8  ;;  %v424_v28 = vadd.f32 %v400_v19, %v1976_v10 }
  0xe6   :  { %1518 = vpow2.f32 %v1330_v7 }
  0xe7   :  { %v1495_v13 = vpop.eup %1494  ;;  %1520 = vpow2.f32 %v1324_v12  ;;  %v427_v18 = vadd.f32 %v403_v6, %v1976_v10  ;;  %v1340_v11 = vmul.f32 -1.442695, %v424_v28 }
  0xe8   :  { %v1497_v26 = vpop.eup %1496  ;;  %v434_v29 = vadd.f32 1.0, %v1495_v13  ;;  %1522 = vpow2.f32 %v1325_v17 }
  0xe9   :  { %v2025_v30 = vpop.eup %1498  ;;  %1524 = vtanh.f32 %v157_v20  ;;  %v486_v51 = vadd.f32 1.0, %v1497_v26 }
  0xea   :  { %v2030_v35 = vpop.eup %1500  ;;  %1526 = vrcp.f32 %v434_v29 }
  0xeb   :  { %v1503_v36 = vpop.eup %1502  ;;  %1528 = vrcp.f32 %v484_v24 }
  0xec   :  { %v1505_v39 = vpop.eup %1504  ;;  %1530 = vrcp.f32 %v485_v27  ;;  %v435_v43 = vadd.f32 1.0, %v1503_v36  ;;  %v1341_v27 = vmul.f32 -1.442695, %v427_v18 }
  0xed   :  { %v1507_v44 = vpop.eup %1506  ;;  %1532 = vtanh.f32 %v163_v33  ;;  %v548_v1 = vadd.f32 1.0, %v1505_v39 }
  0xee   :  { %v2038_v57 = vpop.eup %1508  ;;  %1534 = vrcp.f32 %v435_v43  ;;  %v487_v62 = vadd.f32 1.0, %v1507_v44 }
  0xef   :  { %v2040_v48 = vpop.eup %1510  ;;  %1536 = vtanh.f32 %v420_v37  ;;  %v423_v37 = vadd.f32 %v399_v25, %v1982_v14 }
  0xf0   :  { %v1513_v50 = vpop.eup %1512  ;;  %1538 = vpow2.f32 %v1339_v41  ;;  %v551_v45 = vadd.f32 1.0, %v2040_v48 }
  0xf1   :  { %v1515_v59 = vpop.eup %1514  ;;  %1540 = vpow2.f32 %v1333_v46 }
  0xf2   :  { %v1517_v61 = vpop.eup %1516  ;;  %1542 = vpow2.f32 %v1332_v47  ;;  %v549_v24 = vadd.f32 1.0, %v1515_v59 }
  0xf3   :  { %v1519_v63 = vpop.eup %1518  ;;  %1544 = vtanh.f32 %v417_v40  ;;  %v489_v9 = vadd.f32 1.0, %v1517_v61 }
  0xf4   :  { %v1521_v2 = vpop.eup %1520  ;;  %1546 = vrcp.f32 %v486_v51  ;;  %v488_v12 = vadd.f32 1.0, %v1519_v63 }
  0xf5   :  { %v1523_v7 = vpop.eup %1522  ;;  %1548 = vpow2.f32 %v1338_v60  ;;  %v450_v16 = vadd.f32 1.0, %v1521_v2 }
  0xf6   :  { %v1525_v58 = vpop.eup %1524  ;;  %1550 = vrcp.f32 %v487_v62  ;;  %v451_v8 = vadd.f32 1.0, %v1523_v7 }
  0xf7   :  { %v1527_v15 = vpop.eup %1526  ;;  %1552 = vrcp.f32 %v548_v1 }
  0xf8   :  { %v1529_v17 = vpop.eup %1528  ;;  %1554 = vtanh.f32 %v426_v54  ;;  %v442_v20 = vmul.f32 %v1527_v15, %v1525_v58 }
  0xf9   :  { %v1531_v22 = vpop.eup %1530  ;;  %1556 = vrcp.f32 %v489_v9  ;;  %v516_v32 = vmul.f32 %v1529_v17, %v2030_v35  ;;  %v550_v35 = vadd.f32 1.0, %v2025_v30 }
  0xfa   :  { %v1533_v23 = vpop.eup %1532  ;;  %1558 = vrcp.f32 %v488_v12  ;;  %v517_v34 = vmul.f32 %v1531_v22, %v1513_v50 }
  0xfb   :  { %v1535_v13 = vpop.eup %1534  ;;  %1560 = vrcp.f32 %v450_v16 }
  0xfc   :  { %v1537_v26 = vpop.eup %1536  ;;  %1562 = vtanh.f32 %v442_v20  ;;  %v443_v29 = vmul.f32 %v1535_v13, %v1533_v23 }
  0xfd   :  { %v1539_v31 = vpop.eup %1538  ;;  %1564 = vrcp.f32 %v451_v8 }
  0xfe   :  { %v1541_v33 = vpop.eup %1540  ;;  %1566 = vtanh.f32 %v443_v29  ;;  %v553_v59 = vadd.f32 1.0, %v1539_v31 }
  0xff   :  { %v1543_v36 = vpop.eup %1542  ;;  %1568 = vrcp.f32 %v549_v24  ;;  %v491_v41 = vadd.f32 1.0, %v1541_v33 }
 0x100   :  { %v1545_v38 = vpop.eup %1544  ;;  %1570 = vpow2.f32 %v1341_v27  ;;  %v490_v42 = vadd.f32 1.0, %v1543_v36 }
 0x101   :  { %v1547_v39 = vpop.eup %1546  ;;  %1572 = vtanh.f32 %v516_v32 }
 0x102   :  { %v1549_v10 = vpop.eup %1548  ;;  %1574 = vtanh.f32 %v517_v34  ;;  %v518_v14 = vmul.f32 %v1547_v39, %v2021_v21 }
 0x103   :  { %v1551_v43 = vpop.eup %1550  ;;  %1576 = vtanh.f32 %v423_v37  ;;  %v552_v60 = vadd.f32 1.0, %v1549_v10 }
 0x104   :  { %v1553_v44 = vpop.eup %1552  ;;  %1578 = vpow2.f32 %v1340_v11  ;;  %v519_v40 = vmul.f32 %v1551_v43, %v2038_v57 }
 0x105   :  { %v1555_v46 = vpop.eup %1554  ;;  %1580 = vrcp.f32 %v491_v41 }
 0x106   :  { %v1557_v47 = vpop.eup %1556  ;;  %1582 = vrcp.f32 %v490_v42  ;;  %v625_v42 = vld [vmem:[%s2184_s5] sm:$0x7] }
 0x107   :  { %v1559_v50 = vpop.eup %1558  ;;  %1584 = vrcp.f32 %v550_v35  ;;  %v521_v63 = vmul.f32 %v1557_v47, %v1537_v26  ;;  %v2074_v43 = vrot.slane %v625_v42, %v1941_v49  ;;  %v2077_v35 = vrot.slane %v625_v42, %v1958_v55 }
 0x108   :  { %v1561_v51 = vpop.eup %1560  ;;  %1586 = vrcp.f32 %v551_v45  ;;  %v520_v2 = vmul.f32 %v1559_v50, %v1545_v38 }
 0x109   :  { %v1563_v52 = vpop.eup %1562  ;;  %1588 = vtanh.f32 %v518_v14 }
 0x10a   :  { %v1565_v30 = vpop.eup %1564  ;;  %1590 = vtanh.f32 %v519_v40  ;;  %v458_v61 = vmul.f32 %v1563_v52, %v1561_v51 }
 0x10b   :  { %v1567_v53 = vpop.eup %1566  ;;  %1592 = vrcp.f32 %v553_v59 }
 0x10c   :  { %v1569_v48 = vpop.eup %1568  ;;  %v459_v62 = vmul.f32 %v1567_v53, %v1565_v30  ;;  %1594 = vrcp.f32 %v552_v60 }
 0x10d   :  { %v1571_v21 = vpop.eup %1570  ;;  %1596 = vtanh.f32 %v521_v63  ;;  %v2085_v63 = vrot.slane %v625_v42, %v1961_v56 }
 0x10e   :  { %v1573_v1 = vpop.eup %1572  ;;  %v588_v57 = vpack.c.bf16 %v459_v62, %v458_v61  ;;  %1598 = vtanh.f32 %v520_v2  ;;  %v555_v16 = vadd.f32 1.0, %v1571_v21 }
 0x10f   :  { %v1575_v6 = vpop.eup %1574  ;;  %v580_v58 = vmul.f32 %v1573_v1, %v1553_v44 }
 0x110   :  { %v1577_v54 = vpop.eup %1576  ;;  %803 = vmatmul.mubr.bf16.vlgmr.msra.gmra.mxu0 %v588_v57  ;;  %1425 = vmatmul.mubr.bf16.vlgmr.msra.gmra.mxu1 %v588_v57  ;;  %v581_v12 = vmul.f32 %v1575_v6, %v1569_v48  ;;  %1600 = vrcp.f32 %v555_v16 }
 0x111   :  { %v1579_v7 = vpop.eup %1578  ;;  %812 = vmatprep.mubr.bf16.mxu0 %v1803_v5  ;;  %1428 = vmatprep.mubr.msk.bf16.mxu1 %vm1804_vm2, %v1802_v3 }
 0x112   :  { %v1581_v9 = vpop.eup %1580  ;;  %v554_v18 = vadd.f32 1.0, %v1579_v7  ;;  %v589_v23 = vpack.c.bf16 %v581_v12, %v580_v58 }
 0x113   :  { %v1583_v15 = vpop.eup %1582  ;;  %v523_v20 = vmul.f32 %v1581_v9, %v1555_v46 }
 0x114   :  { %v1585_v17 = vpop.eup %1584  ;;  %v522_v8 = vmul.f32 %v1583_v15, %v1577_v54  ;;  %1602 = vrcp.f32 %v554_v18 }
 0x115   :  { %v1587_v19 = vpop.eup %1586  ;;  %1604 = vtanh.f32 %v523_v20 }
 0x116   :  { %v1589_v22 = vpop.eup %1588  ;;  %1606 = vtanh.f32 %v522_v8 }
 0x117   :  { %v1591_v13 = vpop.eup %1590  ;;  %v582_v24 = vmul.f32 %v1589_v22, %v1585_v17 }
 0x118   :  { %813 = vmatmul.mubr.bf16.gmra.mxu0 %v589_v23  ;;  %1429 = vmatmul.mubr.bf16.gmra.mxu1 %v589_v23  ;;  %v583_v25 = vmul.f32 %v1591_v13, %v1587_v19  ;;  %v1593_v26 = vpop.eup %1592 }
 0x119   :  { %822 = vmatprep.mubr.bf16.mxu0 %v1803_v5  ;;  %1432 = vmatprep.mubr.msk.bf16.mxu1 %vm1804_vm2, %v1802_v3  ;;  %v1595_v27 = vpop.eup %1594 }
 0x11a   :  { %v1597_v28 = vpop.eup %1596  ;;  %v590_v29 = vpack.c.bf16 %v583_v25, %v582_v24 }
 0x11b   :  { %v1599_v31 = vpop.eup %1598  ;;  %v585_v33 = vmul.f32 %v1597_v28, %v1593_v26 }
 0x11c   :  { %v584_v32 = vmul.f32 %v1599_v31, %v1595_v27 }
 0x11d   :  { %v1601_v34 = vpop.eup %1600 }
 0x11e   :  { %v591_v38 = vpack.c.bf16 %v585_v33, %v584_v32 }
 0x120   :  { %823 = vmatmul.mubr.bf16.gmra.mxu0 %v590_v29  ;;  %1433 = vmatmul.mubr.bf16.gmra.mxu1 %v590_v29 }
 0x121   :  { %832 = vmatprep.mubr.bf16.mxu0 %v1803_v5  ;;  %1436 = vmatprep.mubr.msk.bf16.mxu1 %vm1804_vm2, %v1802_v3  ;;  %v1603_v36 = vpop.eup %1602 }
 0x122   :  { %v1605_v37 = vpop.eup %1604 }
 0x123   :  { %v1607_v11 = vpop.eup %1606  ;;  %v587_v41 = vmul.f32 %v1605_v37, %v1601_v34 }
 0x124   :  { %v586_v39 = vmul.f32 %v1607_v11, %v1603_v36 }
 0x126   :  { %v592_v10 = vpack.c.bf16 %v587_v41, %v586_v39 }
 0x128   :  { %833 = vmatmul.mubr.bf16.gmra.mxu0 %v591_v38  ;;  %1437 = vmatmul.mubr.bf16.gmra.mxu1 %v591_v38 }
 0x129   :  { %842 = vmatprep.mubr.bf16.mxu0 %v1803_v5  ;;  %1440 = vmatprep.mubr.msk.bf16.mxu1 %vm1804_vm2, %v1802_v3 }
 0x130   :  { %843 = vmatmul.mubr.bf16.gmra.mxu0 %v592_v10  ;;  %1441 = vmatmul.mubr.bf16.gmra.mxu1 %v592_v10 }
 0x1d0   :  { %v804_v44 = vpop.f32.mrf.mxu0  ;;  %v887_v5 = vpop.f32.mrf.mxu1 }
 0x1d1   :  { %v805_v45 = vadd.f32 %v804_v44, %v2074_v43  ;;  %v888_v47 = vadd.f32 %v887_v5, %v2077_v35 }
 0x1d2   :  { %v806_v3 = vpop.f32.mrf.mxu0  ;;  %v1426_v46 = vpop.f32.mrf.mxu1 }
 0x1d3   :  { %v1366_v14 = vmul.f32 -1.442695, %v805_v45  ;;  %v1376_v55 = vmul.f32 -1.442695, %v888_v47  ;;  %v807_v58 = vadd.f32 %v806_v3, %v2085_v63 }
 0x1d4   :  { %v808_v40 = vpop.f32.mrf.mxu0  ;;  %v890_v50 = vpop.f32.mrf.mxu1 }
 0x1d5   :  { %1608 = vpow2.f32 %v1366_v14  ;;  %v809_v51 = vadd.f32 %v808_v40, %v2074_v43  ;;  %v891_v49 = vadd.f32 %v890_v50, %v2077_v35 }
 0x1d6   :  { %v810_v52 = vpop.f32.mrf.mxu0  ;;  %v1427_v30 = vpop.f32.mrf.mxu1 }
 0x1d7   :  { %v1367_v53 = vmul.f32 -1.442695, %v809_v51  ;;  %v1377_v61 = vmul.f32 -1.442695, %v891_v49  ;;  %v811_v13 = vadd.f32 %v810_v52, %v2085_v63 }
 0x1d8   :  { %v814_v59 = vpop.f32.mrf.mxu0  ;;  %v895_v48 = vpop.f32.mrf.mxu1 }
 0x1d9   :  { %1610 = vpow2.f32 %v1367_v53  ;;  %v815_v60 = vadd.f32 %v814_v59, %v2074_v43  ;;  %v896_v2 = vadd.f32 %v895_v48, %v2077_v35 }
 0x1da   :  { %v816_v62 = vpop.f32.mrf.mxu0  ;;  %v1430_v21 = vpop.f32.mrf.mxu1  ;;  %1612 = vpow2.f32 %v1376_v55 }
 0x1db   :  { %v1368_v1 = vmul.f32 -1.442695, %v815_v60  ;;  %v1378_v15 = vmul.f32 -1.442695, %v896_v2  ;;  %v817_v28 = vadd.f32 %v816_v62, %v2085_v63 }
 0x1dc   :  { %v818_v57 = vpop.f32.mrf.mxu0  ;;  %v898_v6 = vpop.f32.mrf.mxu1 }
 0x1dd   :  { %1614 = vpow2.f32 %v1368_v1  ;;  %v819_v54 = vadd.f32 %v818_v57, %v2074_v43  ;;  %v899_v8 = vadd.f32 %v898_v6, %v2077_v35 }
 0x1de   :  { %1616 = vpow2.f32 %v1377_v61  ;;  %v820_v7 = vpop.f32.mrf.mxu0  ;;  %v1431_v9 = vpop.f32.mrf.mxu1 }
 0x1df   :  { %v1369_v12 = vmul.f32 -1.442695, %v819_v54  ;;  %v1379_v33 = vmul.f32 -1.442695, %v899_v8  ;;  %v821_v41 = vadd.f32 %v820_v7, %v2085_v63 }
 0x1e0   :  { %v824_v16 = vpop.f32.mrf.mxu0  ;;  %v903_v17 = vpop.f32.mrf.mxu1 }
 0x1e1   :  { %1618 = vpow2.f32 %v1369_v12  ;;  %v825_v56 = vadd.f32 %v824_v16, %v2074_v43  ;;  %v904_v36 = vadd.f32 %v903_v17, %v2077_v35 }
 0x1e2   :  { %v1609_v18 = vpop.eup %1608  ;;  %v826_v19 = vpop.f32.mrf.mxu0  ;;  %1620 = vtanh.f32 %v807_v58 }
 0x1e3   :  { %v1434_v20 = vpop.f32.mrf.mxu1  ;;  %v956_v22 = vadd.f32 1.0, %v1609_v18  ;;  %v1370_v23 = vmul.f32 -1.442695, %v825_v56  ;;  %1622 = vpow2.f32 %v1378_v15  ;;  %v1380_v46 = vmul.f32 -1.442695, %v904_v36 }
 0x1e4   :  { %v828_v24 = vpop.f32.mrf.mxu0  ;;  %v827_v62 = vadd.f32 %v826_v19, %v2085_v63 }
 0x1e5   :  { %v906_v25 = vpop.f32.mrf.mxu1  ;;  %1624 = vrcp.f32 %v956_v22  ;;  %v829_v26 = vadd.f32 %v828_v24, %v2074_v43 }
 0x1e6   :  { %v1611_v27 = vpop.eup %1610  ;;  %v2095_v29 = vpop.f32.mrf.mxu0  ;;  %1626 = vpow2.f32 %v1370_v23  ;;  %v907_v14 = vadd.f32 %v906_v25, %v2077_v35 }
 0x1e7   :  { %v1435_v31 = vpop.f32.mrf.mxu1  ;;  %v957_v32 = vadd.f32 1.0, %v1611_v27  ;;  %v1613_v34 = vpop.eup %1612  ;;  %1628 = vtanh.f32 %v811_v13  ;;  %v1371_v37 = vmul.f32 -1.442695, %v829_v26  ;;  %v831_v19 = vadd.f32 %v2095_v29, %v2085_v63 }
 0x1e8   :  { %v834_v38 = vpop.f32.mrf.mxu0  ;;  %v1036_v5 = vadd.f32 1.0, %v1613_v34  ;;  %v1381_v59 = vmul.f32 -1.442695, %v907_v14  ;;  %v2124_v14 = vld [vmem:[%s2185_s6] ss:$0 sm:$0xff] }
 0x1e9   :  { %v911_v11 = vpop.f32.mrf.mxu1  ;;  %1630 = vrcp.f32 %v957_v32  ;;  %v835_v3 = vadd.f32 %v834_v38, %v2074_v43 }
 0x1ea   :  { %v1615_v39 = vpop.eup %1614  ;;  %1632 = vtanh.f32 %v817_v28  ;;  %v2099_v10 = vpop.f32.mrf.mxu0  ;;  %v912_v15 = vadd.f32 %v911_v11, %v2077_v35 }
 0x1eb   :  { %v1438_v42 = vpop.f32.mrf.mxu1  ;;  %v1617_v44 = vpop.eup %1616  ;;  %v958_v45 = vadd.f32 1.0, %v1615_v39  ;;  %1634 = vpow2.f32 %v1379_v33  ;;  %v1372_v30 = vmul.f32 -1.442695, %v835_v3 }
 0x1ec   :  { %1636 = vpow2.f32 %v1371_v37  ;;  %v838_v47 = vpop.f32.mrf.mxu0  ;;  %v1037_v51 = vadd.f32 1.0, %v1617_v44  ;;  %v1382_v25 = vmul.f32 -1.442695, %v912_v15  ;;  %v837_v37 = vadd.f32 %v2099_v10, %v2085_v63 }
 0x1ed   :  { %v914_v40 = vpop.f32.mrf.mxu1  ;;  %1638 = vrcp.f32 %v958_v45  ;;  %v839_v21 = vadd.f32 %v838_v47, %v2074_v43 }
 0x1ee   :  { %v1619_v50 = vpop.eup %1618  ;;  %1640 = vtanh.f32 %v821_v41  ;;  %v2103_v55 = vpop.f32.mrf.mxu0  ;;  %v915_v34 = vadd.f32 %v914_v40, %v2077_v35 }
 0x1ef   :  { %v1439_v49 = vpop.f32.mrf.mxu1  ;;  %1642 = vrcp.f32 %v1036_v5  ;;  %v959_v52 = vadd.f32 1.0, %v1619_v50  ;;  %v1621_v53 = vpop.eup %1620  ;;  %v1373_v16 = vmul.f32 -1.442695, %v839_v21  ;;  %v841_v50 = vadd.f32 %v2103_v55, %v2085_v63 }
 0x1f0   :  { %1644 = vpow2.f32 %v1380_v46  ;;  %v1623_v60 = vpop.eup %1622  ;;  %v844_v57 = vpop.f32.mrf.mxu0  ;;  %v1383_v45 = vmul.f32 -1.442695, %v915_v34 }
 0x1f1   :  { %v2105_v48 = vpop.f32.mrf.mxu1  ;;  %1646 = vrcp.f32 %v959_v52  ;;  %v1038_v54 = vadd.f32 1.0, %v1623_v60  ;;  %v845_v8 = vadd.f32 %v844_v57, %v2074_v43 }
 0x1f2   :  { %v1625_v61 = vpop.eup %1624  ;;  %1648 = vrcp.f32 %v1037_v51  ;;  %v2114_v20 = vpop.f32.mrf.mxu0 }
 0x1f3   :  { %v1442_v1 = vpop.f32.mrf.mxu1  ;;  %v996_v2 = vmul.f32 %v1625_v61, %v1621_v53  ;;  %1650 = vpow2.f32 %v1372_v30  ;;  %v1627_v6 = vpop.eup %1626  ;;  %v1374_v29 = vmul.f32 -1.442695, %v845_v8 }
 0x1f4   :  { %1652 = vpow2.f32 %v1381_v59  ;;  %v1629_v9 = vpop.eup %1628  ;;  %v960_v58 = vadd.f32 1.0, %v1627_v6  ;;  %v848_v31 = vpop.f32.mrf.mxu0 }
 0x1f5   :  { %v2109_v7 = vpop.f32.mrf.mxu1  ;;  %1654 = vtanh.f32 %v996_v2  ;;  %v849_v38 = vadd.f32 %v848_v31, %v2074_v43  ;;  %v920_v43 = vadd.f32 %v2105_v48, %v2077_v35 }
 0x1f6   :  { %v1631_v12 = vpop.eup %1630  ;;  %1656 = vtanh.f32 %v827_v62  ;;  %v923_v55 = vadd.f32 %v2109_v7, %v2077_v35 }
 0x1f7   :  { %v1443_v17 = vpop.f32.mrf.mxu1  ;;  %v1633_v56 = vpop.eup %1632  ;;  %v997_v18 = vmul.f32 %v1631_v12, %v1629_v9  ;;  %1658 = vrcp.f32 %v960_v58  ;;  %v1375_v46 = vmul.f32 -1.442695, %v849_v38  ;;  %v1384_v60 = vmul.f32 -1.442695, %v920_v43 }
 0x1f8   :  { %v1635_v22 = vpop.eup %1634  ;;  %1660 = vrcp.f32 %v1038_v54  ;;  %v847_v54 = vadd.f32 %v2114_v20, %v2085_v63  ;;  %v1385_v15 = vmul.f32 -1.442695, %v923_v55 }
 0x1f9   :  { %v1637_v23 = vpop.eup %1636  ;;  %1662 = vtanh.f32 %v997_v18  ;;  %v1039_v28 = vadd.f32 1.0, %v1635_v22 }
 0x1fa   :  { %v1639_v13 = vpop.eup %1638  ;;  %v961_v24 = vadd.f32 1.0, %v1637_v23  ;;  %1664 = vpow2.f32 %v1373_v16 }
 0x1fb   :  { %v1641_v26 = vpop.eup %1640  ;;  %v998_v27 = vmul.f32 %v1639_v13, %v1633_v56  ;;  %1666 = vtanh.f32 %v831_v19  ;;  %v850_v56 = vpop.f32.mrf.mxu0 }
 0x1fc   :  { %v1643_v32 = vpop.eup %1642  ;;  %1668 = vrcp.f32 %v961_v24  ;;  %v851_v23 = vadd.f32 %v850_v56, %v2085_v63 }
 0x1fd   :  { %v1645_v33 = vpop.eup %1644  ;;  %1670 = vtanh.f32 %v998_v27 }
 0x1fe   :  { %v1647_v36 = vpop.eup %1646  ;;  %1672 = vpow2.f32 %v1382_v25  ;;  %v1040_v42 = vadd.f32 1.0, %v1645_v33 }
 0x1ff   :  { %v1649_v11 = vpop.eup %1648  ;;  %1674 = vrcp.f32 %v1039_v28  ;;  %v999_v39 = vmul.f32 %v1647_v36, %v1641_v26 }
 0x200   :  { %v1651_v41 = vpop.eup %1650  ;;  %1676 = vpow2.f32 %v1374_v29 }
 0x201   :  { %v1653_v44 = vpop.eup %1652  ;;  %1678 = vtanh.f32 %v999_v39  ;;  %v962_v5 = vadd.f32 1.0, %v1651_v41 }
 0x202   :  { %v1655_v3 = vpop.eup %1654  ;;  %1680 = vtanh.f32 %v837_v37  ;;  %v1041_v52 = vadd.f32 1.0, %v1653_v44 }
 0x203   :  { %v1657_v10 = vpop.eup %1656  ;;  %1682 = vrcp.f32 %v962_v5  ;;  %v1076_v47 = vmul.f32 %v1655_v3, %v1643_v32 }
 0x204   :  { %v1659_v40 = vpop.eup %1658  ;;  %1684 = vrcp.f32 %v1040_v42 }
 0x205   :  { %v1661_v51 = vpop.eup %1660  ;;  %v1000_v49 = vmul.f32 %v1659_v40, %v1657_v10  ;;  %1686 = vpow2.f32 %v1383_v45  ;;  %v1093_v30 = vmul.f32 %v2124_v14, %v1076_v47 }
 0x206   :  { %v1663_v53 = vpop.eup %1662  ;;  %1688 = vpow2.f32 %v1375_v46 }
 0x207   :  { %v1665_v59 = vpop.eup %1664  ;;  %1690 = vtanh.f32 %v1000_v49  ;;  %1103 = vadd.xlane.f32.xlu0 %v1093_v30  ;;  %v1077_v61 = vmul.f32 %v1663_v53, %v1649_v11 }
 0x208   :  { %v1667_v48 = vpop.eup %1666  ;;  %v963_v62 = vadd.f32 1.0, %v1665_v59  ;;  %1692 = vtanh.f32 %v841_v50 }
 0x209   :  { %v1669_v21 = vpop.eup %1668  ;;  %1694 = vrcp.f32 %v1041_v52  ;;  %v1094_v1 = vmul.f32 %v2124_v14, %v1077_v61 }
 0x20a   :  { %v1671_v2 = vpop.eup %1670  ;;  %v1001_v57 = vmul.f32 %v1669_v21, %v1667_v48  ;;  %1696 = vrcp.f32 %v963_v62 }
 0x20b   :  { %v1673_v6 = vpop.eup %1672  ;;  %1698 = vpow2.f32 %v1384_v60  ;;  %1105 = vadd.xlane.f32.xlu1 %v1094_v1  ;;  %v1078_v9 = vmul.f32 %v1671_v2, %v1661_v51 }
 0x20c   :  { %v1675_v58 = vpop.eup %1674  ;;  %1700 = vtanh.f32 %v1001_v57  ;;  %v1042_v35 = vadd.f32 1.0, %v1673_v6 }
 0x20d   :  { %v1677_v12 = vpop.eup %1676  ;;  %v1095_v16 = vmul.f32 %v2124_v14, %v1078_v9  ;;  %1702 = vtanh.f32 %v847_v54 }
 0x20e   :  { %v1679_v17 = vpop.eup %1678  ;;  %v964_v7 = vadd.f32 1.0, %v1677_v12 }
 0x20f   :  { %v1681_v18 = vpop.eup %1680  ;;  %1107 = vadd.xlane.f32.xlu0 %v1095_v16  ;;  %v1079_v19 = vmul.f32 %v1679_v17, %v1675_v58  ;;  %v1144_v58 = vand.u32 127, %v56_v0 }
 0x210   :  { %v1683_v22 = vpop.eup %1682  ;;  %1704 = vrcp.f32 %v964_v7 }
 0x211   :  { %v1685_v8 = vpop.eup %1684  ;;  %v1002_v20 = vmul.f32 %v1683_v22, %v1681_v18  ;;  %1706 = vpow2.f32 %v1385_v15  ;;  %v1096_v13 = vmul.f32 %v2124_v14, %v1079_v19  ;;  %v1124_v15 = vstv %s2186_s7  ;;  %s1805_s7 = smov [#allocation7]  }
 0x212   :  { %v1687_v24 = vpop.eup %1686  ;;  %1708 = vrcp.f32 %v1042_v35  ;;  %v1149_v16 = vadd.s32 4294967288, %v1144_v58  ;;  %v1147_v0 = vsub.s32 %v1144_v58, %v1867_v4  ;;  %s1298_s24 = sshll.u32 %s1805_s7, 4  ;;  %s1299_s24 = int_to_ptr.vmem [resolvable:$true] %s1298_s24 }
 0x213   :  { %v1689_v25 = vpop.eup %1688  ;;  %1710 = vtanh.f32 %v1002_v20  ;;  %1109 = vadd.xlane.f32.xlu0 %v1096_v13  ;;  %v1043_v31 = vadd.f32 1.0, %v1687_v24  ;;  %s1752_s25 = scalar_lea.vmem %s1299_s24, 64  ;;  %p1757_p6 = scmp.lt.s32.totalorder %s1299_s24, %s1299_s24 }
 0x214   :  { %v1691_v26 = vpop.eup %1690  ;;  %v965_v27 = vadd.f32 1.0, %v1689_v25  ;;  %1712 = vtanh.f32 %v851_v23  ;;  %v1152_v22 = vsub.s32 %v1149_v16, %v1867_v4  ;;  %p1753_p5 = scmp.ne.s32.totalorder %s1299_s24, %s1752_s25  ;;  %p1758_p7 = scmp.lt.s32.totalorder %s1752_s25, %s1752_s25 }
 0x215   :  { %v1693_v28 = vpop.eup %1692  ;;  %v1080_v32 = vmul.f32 %v1691_v26, %v1685_v8 }
 0x216   :  { %v1695_v29 = vpop.eup %1694  ;;  %1714 = vrcp.f32 %v965_v27  ;;  %p1759_p8 = por %p1758_p7, %p1757_p6 }
 0x217   :  { %v1697_v33 = vpop.eup %1696  ;;  %v1097_v34 = vmul.f32 %v2124_v14, %v1080_v32  ;;  %1716 = vrcp.f32 %v1043_v31 }
 0x218   :  { %v1699_v36 = vpop.eup %1698  ;;  %v1003_v63 = vmul.f32 %v1697_v33, %v1693_v28  ;;  %p1760_p9 = pnand %p1759_p8, %p1753_p5 }
 0x219   :  { %v1701_v37 = vpop.eup %1700  ;;  %1111 = vadd.xlane.f32.xlu1 %v1097_v34  ;;  %v1044_v11 = vadd.f32 1.0, %v1699_v36 }
 0x21a   :  { %1718 = vtanh.f32 %v1003_v63  ;;  %v1081_v38 = vmul.f32 %v1701_v37, %v1695_v29  ;;  %v1703_v39 = vpop.eup %1702 }
 0x21b   :  { %1720 = vrcp.f32 %v1044_v11 }
 0x21c   :  { %v1098_v41 = vmul.f32 %v2124_v14, %v1081_v38 }
 0x21d   :  { %v1705_v42 = vpop.eup %1704 }
 0x21e   :  { %v1707_v44 = vpop.eup %1706  ;;  %v1004_v5 = vmul.f32 %v1705_v42, %v1703_v39  ;;  %1113 = vadd.xlane.f32.xlu0 %v1098_v41 }
 0x21f   :  { %v1709_v45 = vpop.eup %1708  ;;  %v1045_v46 = vadd.f32 1.0, %v1707_v44 }
 0x220   :  { %v1711_v3 = vpop.eup %1710  ;;  %1722 = vtanh.f32 %v1004_v5 }
 0x221   :  { %v1082_v10 = vmul.f32 %v1711_v3, %v1709_v45  ;;  %v1713_v43 = vpop.eup %1712  ;;  %1724 = vrcp.f32 %v1045_v46 }
 0x223   :  { %v1715_v47 = vpop.eup %1714  ;;  %v1099_v40 = vmul.f32 %v2124_v14, %v1082_v10 }
 0x224   :  { %v1005_v50 = vmul.f32 %v1715_v47, %v1713_v43  ;;  %v1717_v51 = vpop.eup %1716 }
 0x225   :  { %1115 = vadd.xlane.f32.xlu1 %v1099_v40 }
 0x226   :  { %1726 = vtanh.f32 %v1005_v50 }
 0x227   :  { %v1719_v49 = vpop.eup %1718 }
 0x228   :  { %v1083_v52 = vmul.f32 %v1719_v49, %v1717_v51  ;;  %v1721_v53 = vpop.eup %1720 }
 0x22a   :  { %v1100_v30 = vmul.f32 %v2124_v14, %v1083_v52 }
 0x22c   :  { %1117 = vadd.xlane.f32.xlu0 %v1100_v30 }
 0x22d   :  { %v1723_v59 = vpop.eup %1722 }
 0x22e   :  { %v1084_v60 = vmul.f32 %v1723_v59, %v1721_v53  ;;  %v1725_v48 = vpop.eup %1724 }
 0x230   :  { %v1101_v61 = vmul.f32 %v2124_v14, %v1084_v60 }
 0x232   :  { %1119 = vadd.xlane.f32.xlu1 %v1101_v61 }
 0x233   :  { %v1727_v62 = vpop.eup %1726 }
 0x234   :  { %v1085_v21 = vmul.f32 %v1727_v62, %v1725_v48 }
 0x236   :  { %v1102_v55 = vmul.f32 %v2124_v14, %v1085_v21 }
 0x238   :  { %1121 = vadd.xlane.f32.xlu0 %v1102_v55 }
 0x290   :  { %v1104_v1 = vpop.xlane.xlu0 %1103 }
 0x291   :  { %v1125_v23 = vadd.f32 %v1124_v15, %v1104_v1 }
 0x294   :  { %v1106_v6 = vpop.xlane.xlu1 %1105 }
 0x295   :  { %v1126_v14 = vadd.f32 %v1124_v15, %v1106_v6 }
 0x298   :  { %v1108_v2 = vpop.xlane.xlu0 %1107 }
 0x299   :  { %v1127_v19 = vadd.f32 %v1124_v15, %v1108_v2 }
 0x29b   :  { %v1192_v31 = vmul.f32 %v1127_v19, %v1125_v23  ;;  %v1148_v63 = vrot.slane %v1127_v19, %v1147_v0 }
 0x29c   :  { %v1110_v57 = vpop.xlane.xlu0 %1109 }
 0x29d   :  { %v1128_v7 = vadd.f32 %v1124_v15, %v1110_v57  ;;  %v1211_v5 = vrot.slane %v1192_v31, %v1147_v0 }
 0x29f   :  { %v1193_v24 = vmul.f32 %v1128_v7, %v1126_v14  ;;  %v1153_v32 = vrot.slane %v1128_v7, %v1152_v22 }
 0x2a1   :  { %v1215_v37 = vrot.slane %v1193_v24, %v1152_v22  ;;  %v1155_v45 = vsel %vm1154_vm3, %v1153_v32, %v1148_v63 }
 0x2a2   :  { %v1112_v9 = vpop.xlane.xlu1 %1111 }
 0x2a3   :  { %v1129_v18 = vadd.f32 %v1124_v15, %v1112_v9  ;;  %v1216_v51 = vsel %vm1154_vm3, %v1215_v37, %v1211_v5 }
 0x2a5   :  { %v1194_v26 = vmul.f32 %v1129_v18, %v1125_v23  ;;  %v1159_v34 = vrot.slane %v1129_v18, %v1147_v0 }
 0x2a7   :  { %v1114_v54 = vpop.xlane.xlu0 %1113  ;;  %v1220_v39 = vrot.slane %v1194_v26, %v1147_v0 }
 0x2a8   :  { %v1130_v35 = vadd.f32 %v1124_v15, %v1114_v54 }
 0x2aa   :  { %v1195_v13 = vmul.f32 %v1130_v35, %v1126_v14  ;;  %v1163_v27 = vrot.slane %v1130_v35, %v1152_v22 }
 0x2ac   :  { %v1224_v36 = vrot.slane %v1195_v13, %v1152_v22  ;;  %v1164_v41 = vsel %vm1154_vm3, %v1163_v27, %v1159_v34 }
 0x2ad   :  { %v1184_v50 = vsel %vm1183_vm4, %v1164_v41, %v1155_v45 }
 0x2ae   :  { %v1116_v17 = vpop.xlane.xlu1 %1115  ;;  %v1225_v40 = vsel %vm1154_vm3, %v1224_v36, %v1220_v39 }
 0x2af   :  { %v1131_v8 = vadd.f32 %v1124_v15, %v1116_v17  ;;  %v1244_v60 = vsel %vm1183_vm4, %v1225_v40, %v1216_v51 }
 0x2b1   :  { %v1196_v29 = vmul.f32 %v1131_v8, %v1125_v23  ;;  %v1168_v38 = vrot.slane %v1131_v8, %v1147_v0 }
 0x2b3   :  { %v1229_v3 = vrot.slane %v1196_v29, %v1147_v0 }
 0x2b5   :  { %v1118_v12 = vpop.xlane.xlu0 %1117 }
 0x2b6   :  { %v1132_v56 = vadd.f32 %v1124_v15, %v1118_v12 }
 0x2b8   :  { %v1197_v25 = vmul.f32 %v1132_v56, %v1126_v14  ;;  %v1172_v33 = vrot.slane %v1132_v56, %v1152_v22 }
 0x2ba   :  { %v1233_v11 = vrot.slane %v1197_v25, %v1152_v22  ;;  %v1173_v46 = vsel %vm1154_vm3, %v1172_v33, %v1168_v38 }
 0x2bb   :  { %v1120_v20 = vpop.xlane.xlu1 %1119  ;;  %v1186_v59 = vsel %vm1185_vm5, %v1173_v46, %v1184_v50 }
 0x2bc   :  { %v1133_v28 = vadd.f32 %v1124_v15, %v1120_v20  ;;  %v1234_v49 = vsel %vm1154_vm3, %v1233_v11, %v1229_v3 }
 0x2bd   :  { %v1245_v62 = vsel %vm1185_vm5, %v1234_v49, %v1244_v60 }
 0x2be   :  { %v1198_v42 = vmul.f32 %v1133_v28, %v1125_v23  ;;  %v1177_v10 = vrot.slane %v1133_v28, %v1147_v0 }
 0x2c0   :  { %v1238_v52 = vrot.slane %v1198_v42, %v1147_v0 }
 0x2c1   :  { %v1122_v4 = vpop.xlane.xlu0 %1121 }
 0x2c2   :  { %v1134_v44 = vadd.f32 %v1124_v15, %v1122_v4 }
 0x2c4   :  { %v1181_v43 = vrot.slane %v1134_v44, %v1152_v22  ;;  %v1199_v47 = vmul.f32 %v1134_v44, %v1126_v14 }
 0x2c6   :  { %v1182_v30 = vsel %vm1154_vm3, %v1181_v43, %v1177_v10  ;;  %v1242_v53 = vrot.slane %v1199_v47, %v1152_v22 }
 0x2c7   :  { %v1188_v61 = vsel %vm1187_vm6, %v1182_v30, %v1186_v59 }
 0x2c8   :  { %v1243_v48 = vsel %vm1154_vm3, %v1242_v53, %v1238_v52  ;;  %1191 = vst.msk [vmem:[#allocation7] sm:$0xf] %vm1190_vm7, %v1188_v61 }
 0x2c9   :  { %v1246_v21 = vsel %vm1187_vm6, %v1243_v48, %v1245_v62 }
 0x2ca   :  { %v1248_v55 = vsel %vm1190_vm7, %v1246_v21, 0.0 }
 0x2cb   :  { %1249 = vadd.xlane.f32.xlu1 %v1248_v55 }
 0x2cc   :  { %1763 = shalt.err (!%p1760_p9)
}
 0x2cd   :  { %1301 = dma.vmem_to_hbm [thread:$0]  %s1299_s24, 64, %s2188_s9, [#allocation8]   ;;  %vm1270_vm8 = vcmask 3072   ;;  %vm1280_vm9 = vcmask 122880  }
 0x2ce   :  { %s1806_s29 = smov [#allocation6]  }
 0x2cf   :  { %s1288_s2 = sshll.u32 %s1806_s29, 4  ;;  %s1289_s2 = int_to_ptr.vmem [resolvable:$true] %s1288_s2 }
 0x2d0   :  { %s1772_s30 = scalar_lea.vmem %s1289_s2, 16  ;;  %s1776_s11 = scalar_lea.vmem %s1289_s2, 32 }
 0x2d1   :  { %p1773_p10 = scmp.ne.s32.totalorder %s1289_s2, %s1772_s30  ;;  %p1777_p11 = scmp.lt.s32.totalorder %s1289_s2, %s1289_s2 }
 0x2d2   :  { %p1778_p12 = scmp.lt.s32.totalorder %s1776_s11, %s1772_s30 }
 0x2d4   :  { %p1779_p13 = por %p1778_p12, %p1777_p11 }
 0x2d6   :  { %p1780_p0 = pnand %p1779_p13, %p1773_p10 }
 0x354   :  { %v1250_v1 = vpop.xlane.xlu1 %1249 }
 0x355   :  { %v1251_v2 = vsel %vm81_vm0, %v1250_v1, -inf }
 0x356   :  { %v1252_v57 = vrot.slane %v1251_v2, 4 }
 0x358   :  { %v1253_v6 = vmax.f32 %v1251_v2, %v1252_v57 }
 0x35a   :  { %v1254_v54 = vrot.slane %v1253_v6, 2 }
 0x35c   :  { %v1255_v9 = vmax.f32 %v1253_v6, %v1254_v54 }
 0x35e   :  { %v1256_v58 = vrot.slane %v1255_v9, 1 }
 0x360   :  { %v1257_v12 = vmax.f32 %v1255_v9, %v1256_v58 }
 0x362   :  { %v1258_v15 = vsub.f32 %v1250_v1, %v1257_v12 }
 0x364   :  { %v1259_v16 = vmul.f32 1.442695, %v1258_v15 }
 0x366   :  { %1728 = vpow2.f32 %v1259_v16 }
 0x373   :  { %v1729_v17 = vpop.eup %1728 }
 0x374   :  { %v1261_v35 = vsel %vm81_vm0, %v1729_v17, 0.0 }
 0x375   :  { %v1262_v7 = vrot.slane %v1261_v35, 4 }
 0x377   :  { %v1263_v56 = vadd.f32 %v1262_v7, %v1261_v35 }
 0x379   :  { %v1264_v14 = vrot.slane %v1263_v56, 2 }
 0x37b   :  { %v1265_v18 = vadd.f32 %v1264_v14, %v1263_v56 }
 0x37d   :  { %v1266_v19 = vrot.slane %v1265_v18, 1 }
 0x37f   :  { %v1267_v22 = vadd.f32 %v1266_v19, %v1265_v18 }
 0x381   :  { %1730 = vrcp.f32 %v1267_v22 }
 0x38e   :  { %v1731_v8 = vpop.eup %1730 }
 0x38f   :  { %v1269_v20 = vmul.f32 %v1731_v8, %v1729_v17 }
 0x391   :  { %1271 = vst.msk [vmem:[%s2189_s10] sm:$0xf] %vm1270_vm8, %v1269_v20  ;;  %v1272_v23 = vmul.f32 %v1269_v20, %v1188_v61 }
 0x393   :  { %v1273_v13 = vsel %vm1190_vm7, %v1272_v23, 0.0 }
 0x394   :  { %v1274_v0 = vrot.slane %v1273_v13, 4 }
 0x396   :  { %v1275_v24 = vadd.f32 %v1274_v0, %v1273_v13 }
 0x398   :  { %v1276_v25 = vrot.slane %v1275_v24, 2 }
 0x39a   :  { %v1277_v26 = vadd.f32 %v1276_v25, %v1275_v24 }
 0x39c   :  { %v1278_v27 = vrot.slane %v1277_v26, 1 }
 0x39e   :  { %v1279_v28 = vadd.f32 %v1278_v27, %v1277_v26 }
 0x3a0   :  { %1281 = vst.msk [vmem:[#allocation6] sm:$0x1] %vm1280_vm9, %v1279_v28 }
 0x3a1   :  { %1783 = shalt.err (!%p1780_p0)
}
 0x3a2   :  { %1291 = dma.vmem_to_hbm [thread:$0]  %s1289_s2, 16, %s2187_s8, [#allocation5]  }
 0x3a3   :  { %1794 = dma.done.wait [#allocation5], 16  }
 0x3a4   :  { %1795 = vsyncadd [#allocation5], 4294967280 }
 0x3a5   :  { %1796 = dma.done.wait [#allocation8], 64  }
 0x3a6   :  { %1797 = vsyncadd [#allocation8], 4294967232 }
 0x3a7   :  { %1312 = vsyncpa [#allocation4], 1 }
 0x3a8   :  { %1313 = vsyncpa [#allocation5], 1 }
 0x3a9   :  { %1314 = vsyncpa [#allocation8], 1 }

</bundles_post_ra>
